<compile_context>
chip_gen: v7x
topology: tpu7x:2x2x1
jax: 0.10.0
libtpu: 0.0.40
codegen_flags: <defaults>
</compile_context>

<pallas_src>
import math

import jax
import jax.numpy as jnp
from jax.experimental import pallas as pl
from jax.experimental.pallas import tpu as pltpu


def _round_up(x, m):
    return ((x + m - 1) // m) * m


def _lane_pad(dim):
    # Lane-dense padding.  Real GPT-2 dims (768/3072) are already 256-aligned;
    # 256 alignment keeps the 2x256x256 MXU (v6e/v7x) fully fed for large odd
    # dims, 128 is enough (and optimal on v5e) for small dims.
    mult = 256 if dim >= 256 else 128
    return _round_up(dim, mult)


def _vmem_capacity_bytes():
    try:
        return int(pltpu.get_tpu_info().vmem_capacity_bytes)
    except Exception:
        return 128 << 20  # v5e/v6e default


def _gelu_tanh(x):
    # GELU with tanh approximation (matches nn.GELU(approximate='tanh')), f32 math.
    c = math.sqrt(2.0 / math.pi)
    return 0.5 * x * (1.0 + jnp.tanh(c * (x + 0.044715 * x * x * x)))


def ffn_kernel(x_ref, w1_ref, b1_ref, w2_ref, b2_ref, o_ref, acc_ref):
    hi = pl.program_id(1)

    @pl.when(hi == 0)
    def _():
        acc_ref[...] = jnp.zeros_like(acc_ref)

    # fc1 partial tile: [tm, E_pad] @ [E_pad, tn_h] on the MXU (bf16 in, f32 acc).
    h = jnp.dot(x_ref[...], w1_ref[...], preferred_element_type=jnp.float32)
    # f32 bias add + GELU(tanh) (VPU + EUP), cast fused straight to bf16.
    h = _gelu_tanh(h + b1_ref[...]).astype(jnp.bfloat16)
    # fc2 partial contraction over this H tile, accumulated in f32.
    acc_ref[...] += jnp.dot(h, w2_ref[...], preferred_element_type=jnp.float32)

    @pl.when(hi == pl.num_programs(1) - 1)
    def _():
        # resid dropout in eval mode == identity
        o_ref[...] = (acc_ref[...] + b2_ref[...]).astype(o_ref.dtype)


def prepare_ffn_params(w1, b1, w2, b2):
    """Pad + cast the weights ONCE (hoisted out of the per-call forward path).

    w1: [E, H], b1: [H], w2: [H, E], b2: [E].
    """
    E, H = w1.shape
    E_pad, H_pad = _lane_pad(E), _lane_pad(H)
    w1p = jnp.pad(w1, ((0, E_pad - E), (0, H_pad - H))).astype(jnp.bfloat16)
    w2p = jnp.pad(w2, ((0, H_pad - H), (0, E_pad - E))).astype(jnp.bfloat16)
    b1p = jnp.pad(b1, (0, H_pad - H)).reshape(1, H_pad).astype(jnp.float32)
    b2p = jnp.pad(b2, (0, E_pad - E)).reshape(1, E_pad).astype(jnp.float32)
    return dict(w1=w1p, b1=b1p, w2=w2p, b2=b2p,
                E=E, H=H, E_pad=E_pad, H_pad=H_pad)


def _pick_tm(M, tm_max):
    """Row tile: multiple of 16 (bf16 sublanes), keep row-padding waste small."""
    M16 = _round_up(M, 16)
    if M16 <= tm_max:
        return M16                      # single ragged tile, minimal padding
    candidates = []
    tm = tm_max
    while tm >= 64:
        candidates.append(tm)
        tm //= 2
    best, best_waste = candidates[0], None
    for tm in candidates:
        m_pad = _round_up(M, tm)
        waste = m_pad - M
        if waste * 8 <= m_pad:          # <= 12.5% padded rows
            return tm
        if best_waste is None or waste < best_waste:
            best, best_waste = tm, waste
    return best


def _pick_tn_h(tm, E_pad, H_pad, x_bytes, out_bytes, usable):
    """Largest H tile (dividing H_pad, multiple of 128) whose footprint fits VMEM."""

    def footprint(tn_h):
        n_h = H_pad // tn_h
        w_bufs = 1 if n_h == 1 else 2       # resident weights: single-buffered
        return (2 * tm * E_pad * x_bytes    # x tile double buffer (bf16)
                + 2 * tm * E_pad * out_bytes  # out tile double buffer
                + w_bufs * E_pad * tn_h * 2   # w1 (bf16)
                + w_bufs * tn_h * E_pad * 2   # w2 (bf16)
                + w_bufs * 8 * tn_h * 4       # b1 (sublane-padded f32)
                + 8 * E_pad * 4               # b2 (single buffer)
                + tm * E_pad * 4              # f32 accumulator scratch
                + tm * tn_h * 4               # f32 h intermediate
                + (2 << 20))                  # misc / Mosaic internal headroom

    n_lane = H_pad // 128
    for nb in range(n_lane, 0, -1):
        if n_lane % nb:
            continue
        tn_h = nb * 128
        if footprint(tn_h) <= usable:
            return tn_h, footprint(tn_h)
    # Even the smallest H tile overflows the budget; let compilation report it.
    return 128, footprint(128)


def feed_forward_network(x2d, params, *, tm_max=None, out_dtype=None):
    """x2d: [M, E] tokens-on-rows; params from prepare_ffn_params -> [M, E]."""
    M, E = x2d.shape
    assert E == params["E"], "embed dim mismatch"
    E_pad, H_pad = params["E_pad"], params["H_pad"]
    out_dtype = x2d.dtype if out_dtype is None else out_dtype

    vmem_cap = _vmem_capacity_bytes()
    usable = vmem_cap - vmem_cap // 4      # leave headroom for Mosaic scratch/spill
    if tm_max is None:
        # 128 MiB parts (v5e/v6e) can afford larger row tiles than v7x (64 MiB).
        tm_max = 512 if vmem_cap >= (96 << 20) else 384

    tm = _pick_tm(M, tm_max)
    M_pad = _round_up(M, tm)

    x_bytes = 2                             # bf16 activations into the kernel
    out_bytes = jnp.dtype(out_dtype).itemsize
    tn_h, footprint = _pick_tn_h(tm, E_pad, H_pad, x_bytes, out_bytes, usable)
    n_h = H_pad // tn_h
    resident = (n_h == 1)

    vmem_limit = int(min(max(footprint + (8 << 20), 32 << 20), usable))

    # Activation pad + bf16 cast (weights were padded/cast once at build time).
    xp = jnp.pad(x2d.astype(jnp.bfloat16), ((0, M_pad - M), (0, E_pad - E)))

    grid = (M_pad // tm, n_h)

    weight_reads = 1 if resident else (M_pad // tm)
    cost = pl.CostEstimate(
        flops=4 * M_pad * E_pad * H_pad,            # two matmuls
        transcendentals=M_pad * H_pad,              # tanh in GELU
        bytes_accessed=int(M_pad * E_pad * (x_bytes + out_bytes)
                           + weight_reads * (E_pad * H_pad + H_pad * E_pad) * 2
                           + (H_pad + E_pad) * 4),
    )

    def _spec(shape, index_map, bufs=None):
        if bufs is None:
            return pl.BlockSpec(shape, index_map)
        return pl.BlockSpec(shape, index_map, pipeline_mode=pl.Buffered(bufs))

    def _call(single_buffer_constants):
        sb = 1 if single_buffer_constants else None
        w_bufs = sb if resident else None   # streamed weights keep double-buffering
        grid_spec = pltpu.PrefetchScalarGridSpec(
            num_scalar_prefetch=0,
            grid=grid,
            in_specs=[
                _spec((tm, E_pad), lambda i, h: (i, 0)),            # x tile
                _spec((E_pad, tn_h), lambda i, h: (0, h), w_bufs),  # w1
                _spec((1, tn_h), lambda i, h: (0, h), w_bufs),      # b1
                _spec((tn_h, E_pad), lambda i, h: (h, 0), w_bufs),  # w2
                _spec((1, E_pad), lambda i, h: (0, 0), sb),         # b2 (constant)
            ],
            out_specs=pl.BlockSpec((tm, E_pad), lambda i, h: (i, 0)),
            scratch_shapes=[pltpu.VMEM((tm, E_pad), jnp.float32)],  # fc2 accumulator
        )
        return pl.pallas_call(
            ffn_kernel,
            out_shape=jax.ShapeDtypeStruct((M_pad, E_pad), out_dtype),
            grid_spec=grid_spec,
            compiler_params=pltpu.CompilerParams(
                dimension_semantics=("parallel", "arbitrary"),
                vmem_limit_bytes=vmem_limit),
            cost_estimate=cost,
        )(xp, params["w1"], params["b1"], params["w2"], params["b2"])

    try:
        out_pad = _call(True)
    except Exception:
        # Fallback if this JAX build rejects pl.Buffered(1) on pallas_call specs.
        out_pad = _call(False)

    return out_pad[:M, :E]


def _reference(x, w1, b1, w2, b2):
    # Mixed-precision reference matching the kernel math (bf16 matmuls, f32 acc,
    # f32 GELU, bf16 intermediate into fc2).
    h = jnp.dot(x.astype(jnp.bfloat16), w1.astype(jnp.bfloat16),
                preferred_element_type=jnp.float32) + b1
    h = _gelu_tanh(h).astype(jnp.bfloat16)
    y = jnp.dot(h, w2.astype(jnp.bfloat16),
                preferred_element_type=jnp.float32) + b2
    return y.astype(x.dtype)


if __name__ == "__main__":
    # Small GPT-2-ish config: batch=2, seq=8, embed_dim=32 -> hidden_dim=128
    batch, seq, embed_dim = 2, 8, 32
    hidden_dim = 4 * embed_dim

    key = jax.random.PRNGKey(0)
    kx, k1, k2, k3, k4 = jax.random.split(key, 5)

    x = jax.random.normal(kx, (batch, seq, embed_dim), dtype=jnp.float32)

    # Deterministic param init (uniform like nn.Linear default, fixed seed)
    lim1 = 1.0 / math.sqrt(embed_dim)
    lim2 = 1.0 / math.sqrt(hidden_dim)
    w1 = jax.random.uniform(k1, (embed_dim, hidden_dim), jnp.float32, -lim1, lim1)
    b1 = jax.random.uniform(k2, (hidden_dim,), jnp.float32, -lim1, lim1)
    w2 = jax.random.uniform(k3, (hidden_dim, embed_dim), jnp.float32, -lim2, lim2)
    b2 = jax.random.uniform(k4, (embed_dim,), jnp.float32, -lim2, lim2)

    # One-time weight prep (hoisted out of the forward path).
    params = prepare_ffn_params(w1, b1, w2, b2)

    # Flatten tokens onto rows for the kernel, reshape back after.
    x2d = x.reshape(batch * seq, embed_dim)
    out2d = feed_forward_network(x2d, params)
    out = out2d.reshape(batch, seq, embed_dim)
    jax.block_until_ready(out)

    ref = _reference(x2d, w1, b1, w2, b2).reshape(batch, seq, embed_dim)
    assert out.shape == (batch, seq, embed_dim)
    assert jnp.allclose(out, ref, atol=5e-3, rtol=5e-3), "mismatch vs reference"

    print("KERNEL_OK")
</pallas_src>

<mosaic_0001>
module attributes {stable_mosaic.version = 11 : i64} {
  func.func @ffn_kernel(%arg0: i32, %arg1: i32, %arg2: memref<16x128xbf16, #tpu.memory_space<vmem>>, %arg3: memref<128x128xbf16, #tpu.memory_space<vmem>>, %arg4: memref<1x128xf32, #tpu.memory_space<vmem>>, %arg5: memref<128x128xbf16, #tpu.memory_space<vmem>>, %arg6: memref<1x128xf32, #tpu.memory_space<vmem>>, %arg7: memref<16x128xf32, #tpu.memory_space<vmem>>, %arg8: memref<16x128xf32, #tpu.memory_space<vmem>>) attributes {dimension_semantics = [#tpu.dimension_semantics<parallel>, #tpu.dimension_semantics<arbitrary>], iteration_bounds = array<i64: 1, 1>, scalar_prefetch = 0 : i64, scratch_operands = 1 : i64, tpu.core_type = #tpu.core_type<tc>, window_params = [{transform_indices = @transform_0, window_bounds = array<i64: 16, 128>}, {pipeline_mode = #tpu.pipeline_mode<synchronous>, transform_indices = @transform_1, window_bounds = array<i64: 128, 128>}, {pipeline_mode = #tpu.pipeline_mode<synchronous>, transform_indices = @transform_2, window_bounds = array<i64: 1, 128>}, {pipeline_mode = #tpu.pipeline_mode<synchronous>, transform_indices = @transform_3, window_bounds = array<i64: 128, 128>}, {pipeline_mode = #tpu.pipeline_mode<synchronous>, transform_indices = @transform_4, window_bounds = array<i64: 1, 128>}, {transform_indices = @transform_5, window_bounds = array<i64: 16, 128>}]} {
    %c0_i32 = arith.constant 0 : i32
    %0 = arith.cmpi eq, %arg1, %c0_i32 : i32
    %1 = arith.extui %0 : i1 to i32
    %c0_i32_0 = arith.constant 0 : i32
    %2 = arith.cmpi ne, %1, %c0_i32_0 : i32
    scf.if %2 {
      %cst_19 = arith.constant 0.000000e+00 : f32
      %31 = vector.broadcast %cst_19 : f32 to vector<16x128xf32>
      %c0_20 = arith.constant 0 : index
      %c0_21 = arith.constant 0 : index
      %32 = vector.load %arg8[%c0_20, %c0_21] : memref<16x128xf32, #tpu.memory_space<vmem>>, vector<16x128xf32>
      tpu.vector_store %arg8[%c0_20, %c0_21], %31 {strides = array<i32>} : memref<16x128xf32, #tpu.memory_space<vmem>>, vector<16x128xf32>,
    } else {
    }
    %c0 = arith.constant 0 : index
    %c0_1 = arith.constant 0 : index
    %3 = vector.load %arg2[%c0, %c0_1] : memref<16x128xbf16, #tpu.memory_space<vmem>>, vector<16x128xbf16>
    %c0_2 = arith.constant 0 : index
    %c0_3 = arith.constant 0 : index
    %4 = vector.load %arg3[%c0_2, %c0_3] : memref<128x128xbf16, #tpu.memory_space<vmem>>, vector<128x128xbf16>
    %cst = arith.constant dense<0.000000e+00> : vector<16x128xf32>
    %5 = tpu.matmul %3, %4, %cst {dimension_numbers = #tpu.dot_dimension_numbers<[1], [0], [0], [1], [0, 0, 1, 1], [], []>} : vector<16x128xbf16>, vector<128x128xbf16>, vector<16x128xf32> -> vector<16x128xf32>
    %c0_4 = arith.constant 0 : index
    %c0_5 = arith.constant 0 : index
    %6 = vector.load %arg4[%c0_4, %c0_5] : memref<1x128xf32, #tpu.memory_space<vmem>>, vector<1x128xf32>
    %7 = vector.broadcast %6 : vector<1x128xf32> to vector<16x128xf32>
    %8 = arith.addf %5, %7 : vector<16x128xf32>
    %cst_6 = arith.constant 5.000000e-01 : f32
    %9 = vector.broadcast %cst_6 : f32 to vector<16x128xf32>
    %10 = arith.mulf %9, %8 : vector<16x128xf32>
    %cst_7 = arith.constant 4.471500e-02 : f32
    %11 = vector.broadcast %cst_7 : f32 to vector<16x128xf32>
    %12 = arith.mulf %11, %8 : vector<16x128xf32>
    %13 = arith.mulf %12, %8 : vector<16x128xf32>
    %14 = arith.mulf %13, %8 : vector<16x128xf32>
    %15 = arith.addf %8, %14 : vector<16x128xf32>
    %cst_8 = arith.constant 0.797884583 : f32
    %16 = vector.broadcast %cst_8 : f32 to vector<16x128xf32>
    %17 = arith.mulf %16, %15 : vector<16x128xf32>
    %18 = math.tanh %17 : vector<16x128xf32>
    %cst_9 = arith.constant 1.000000e+00 : f32
    %19 = vector.broadcast %cst_9 : f32 to vector<16x128xf32>
    %20 = arith.addf %19, %18 : vector<16x128xf32>
    %21 = arith.mulf %10, %20 : vector<16x128xf32>
    %22 = arith.truncf %21 : vector<16x128xf32> to vector<16x128xbf16>
    %c0_10 = arith.constant 0 : index
    %c0_11 = arith.constant 0 : index
    %23 = vector.load %arg8[%c0_10, %c0_11] : memref<16x128xf32, #tpu.memory_space<vmem>>, vector<16x128xf32>
    %c0_12 = arith.constant 0 : index
    %c0_13 = arith.constant 0 : index
    %24 = vector.load %arg5[%c0_12, %c0_13] : memref<128x128xbf16, #tpu.memory_space<vmem>>, vector<128x128xbf16>
    %cst_14 = arith.constant dense<0.000000e+00> : vector<16x128xf32>
    %25 = tpu.matmul %22, %24, %cst_14 {dimension_numbers = #tpu.dot_dimension_numbers<[1], [0], [0], [1], [0, 0, 1, 1], [], []>} : vector<16x128xbf16>, vector<128x128xbf16>, vector<16x128xf32> -> vector<16x128xf32>
    %26 = arith.addf %23, %25 : vector<16x128xf32>
    %c0_15 = arith.constant 0 : index
    %c0_16 = arith.constant 0 : index
    %27 = vector.load %arg8[%c0_15, %c0_16] : memref<16x128xf32, #tpu.memory_space<vmem>>, vector<16x128xf32>
    tpu.vector_store %arg8[%c0_15, %c0_16], %26 {strides = array<i32>} : memref<16x128xf32, #tpu.memory_space<vmem>>, vector<16x128xf32>,
    %c0_i32_17 = arith.constant 0 : i32
    %28 = arith.cmpi eq, %arg1, %c0_i32_17 : i32
    %29 = arith.extui %28 : i1 to i32
    %c0_i32_18 = arith.constant 0 : i32
    %30 = arith.cmpi ne, %29, %c0_i32_18 : i32
    scf.if %30 {
      %c0_19 = arith.constant 0 : index
      %c0_20 = arith.constant 0 : index
      %31 = vector.load %arg8[%c0_19, %c0_20] : memref<16x128xf32, #tpu.memory_space<vmem>>, vector<16x128xf32>
      %c0_21 = arith.constant 0 : index
      %c0_22 = arith.constant 0 : index
      %32 = vector.load %arg6[%c0_21, %c0_22] : memref<1x128xf32, #tpu.memory_space<vmem>>, vector<1x128xf32>
      %33 = vector.broadcast %32 : vector<1x128xf32> to vector<16x128xf32>
      %34 = arith.addf %31, %33 : vector<16x128xf32>
      %c0_23 = arith.constant 0 : index
      %c0_24 = arith.constant 0 : index
      %35 = vector.load %arg7[%c0_23, %c0_24] : memref<16x128xf32, #tpu.memory_space<vmem>>, vector<16x128xf32>
      tpu.vector_store %arg7[%c0_23, %c0_24], %34 {strides = array<i32>} : memref<16x128xf32, #tpu.memory_space<vmem>>, vector<16x128xf32>,
    } else {
    }
    return
  }
  func.func @transform_0(%arg0: i32, %arg1: i32) -> (i32, i32) {
    %c0_i32 = arith.constant 0 : i32
    %c0_i32_0 = arith.constant 0 : i32
    return %arg0, %c0_i32 : i32, i32
  }
  func.func @transform_1(%arg0: i32, %arg1: i32) -> (i32, i32) {
    %c0_i32 = arith.constant 0 : i32
    %c0_i32_0 = arith.constant 0 : i32
    return %c0_i32, %arg1 : i32, i32
  }
  func.func @transform_2(%arg0: i32, %arg1: i32) -> (i32, i32) {
    %c0_i32 = arith.constant 0 : i32
    %c0_i32_0 = arith.constant 0 : i32
    return %c0_i32, %arg1 : i32, i32
  }
  func.func @transform_3(%arg0: i32, %arg1: i32) -> (i32, i32) {
    %c0_i32 = arith.constant 0 : i32
    %c0_i32_0 = arith.constant 0 : i32
    return %arg1, %c0_i32 : i32, i32
  }
  func.func @transform_4(%arg0: i32, %arg1: i32) -> (i32, i32) {
    %c0_i32 = arith.constant 0 : i32
    %c0_i32_0 = arith.constant 0 : i32
    %c0_i32_1 = arith.constant 0 : i32
    return %c0_i32, %c0_i32_0 : i32, i32
  }
  func.func @transform_5(%arg0: i32, %arg1: i32) -> (i32, i32) {
    %c0_i32 = arith.constant 0 : i32
    %c0_i32_0 = arith.constant 0 : i32
    return %arg0, %c0_i32 : i32, i32
  }
}

module attributes {stable_mosaic.version = 11 : i64} {
  func.func @ffn_kernel(%arg0: i32, %arg1: i32, %arg2: memref<16x128xbf16, #tpu.memory_space<vmem>>, %arg3: memref<128x128xbf16, #tpu.memory_space<vmem>>, %arg4: memref<1x128xf32, #tpu.memory_space<vmem>>, %arg5: memref<128x128xbf16, #tpu.memory_space<vmem>>, %arg6: memref<1x128xf32, #tpu.memory_space<vmem>>, %arg7: memref<16x128xf32, #tpu.memory_space<vmem>>, %arg8: memref<16x128xf32, #tpu.memory_space<vmem>>) attributes {dimension_semantics = [#tpu.dimension_semantics<parallel>, #tpu.dimension_semantics<arbitrary>], iteration_bounds = array<i64: 1, 1>, scalar_prefetch = 0 : i64, scratch_operands = 1 : i64, tpu.core_type = #tpu.core_type<tc>, window_params = [{transform_indices = @transform_0, window_bounds = array<i64: 16, 128>}, {transform_indices = @transform_1, window_bounds = array<i64: 128, 128>}, {transform_indices = @transform_2, window_bounds = array<i64: 1, 128>}, {transform_indices = @transform_3, window_bounds = array<i64: 128, 128>}, {pipeline_mode = #tpu.pipeline_mode<synchronous>, transform_indices = @transform_4, window_bounds = array<i64: 1, 128>}, {transform_indices = @transform_5, window_bounds = array<i64: 16, 128>}]} {
    %c0_i32 = arith.constant 0 : i32
    %0 = arith.cmpi eq, %arg1, %c0_i32 : i32
    %1 = arith.extui %0 : i1 to i32
    %c0_i32_0 = arith.constant 0 : i32
    %2 = arith.cmpi ne, %1, %c0_i32_0 : i32
    scf.if %2 {
      %cst_19 = arith.constant 0.000000e+00 : f32
      %31 = vector.broadcast %cst_19 : f32 to vector<16x128xf32>
      %c0_20 = arith.constant 0 : index
      %c0_21 = arith.constant 0 : index
      %32 = vector.load %arg8[%c0_20, %c0_21] : memref<16x128xf32, #tpu.memory_space<vmem>>, vector<16x128xf32>
      tpu.vector_store %arg8[%c0_20, %c0_21], %31 {strides = array<i32>} : memref<16x128xf32, #tpu.memory_space<vmem>>, vector<16x128xf32>,
    } else {
    }
    %c0 = arith.constant 0 : index
    %c0_1 = arith.constant 0 : index
    %3 = vector.load %arg2[%c0, %c0_1] : memref<16x128xbf16, #tpu.memory_space<vmem>>, vector<16x128xbf16>
    %c0_2 = arith.constant 0 : index
    %c0_3 = arith.constant 0 : index
    %4 = vector.load %arg3[%c0_2, %c0_3] : memref<128x128xbf16, #tpu.memory_space<vmem>>, vector<128x128xbf16>
    %cst = arith.constant dense<0.000000e+00> : vector<16x128xf32>
    %5 = tpu.matmul %3, %4, %cst {dimension_numbers = #tpu.dot_dimension_numbers<[1], [0], [0], [1], [0, 0, 1, 1], [], []>} : vector<16x128xbf16>, vector<128x128xbf16>, vector<16x128xf32> -> vector<16x128xf32>
    %c0_4 = arith.constant 0 : index
    %c0_5 = arith.constant 0 : index
    %6 = vector.load %arg4[%c0_4, %c0_5] : memref<1x128xf32, #tpu.memory_space<vmem>>, vector<1x128xf32>
    %7 = vector.broadcast %6 : vector<1x128xf32> to vector<16x128xf32>
    %8 = arith.addf %5, %7 : vector<16x128xf32>
    %cst_6 = arith.constant 5.000000e-01 : f32
    %9 = vector.broadcast %cst_6 : f32 to vector<16x128xf32>
    %10 = arith.mulf %9, %8 : vector<16x128xf32>
    %cst_7 = arith.constant 4.471500e-02 : f32
    %11 = vector.broadcast %cst_7 : f32 to vector<16x128xf32>
    %12 = arith.mulf %11, %8 : vector<16x128xf32>
    %13 = arith.mulf %12, %8 : vector<16x128xf32>
    %14 = arith.mulf %13, %8 : vector<16x128xf32>
    %15 = arith.addf %8, %14 : vector<16x128xf32>
    %cst_8 = arith.constant 0.797884583 : f32
    %16 = vector.broadcast %cst_8 : f32 to vector<16x128xf32>
    %17 = arith.mulf %16, %15 : vector<16x128xf32>
    %18 = math.tanh %17 : vector<16x128xf32>
    %cst_9 = arith.constant 1.000000e+00 : f32
    %19 = vector.broadcast %cst_9 : f32 to vector<16x128xf32>
    %20 = arith.addf %19, %18 : vector<16x128xf32>
    %21 = arith.mulf %10, %20 : vector<16x128xf32>
    %22 = arith.truncf %21 : vector<16x128xf32> to vector<16x128xbf16>
    %c0_10 = arith.constant 0 : index
    %c0_11 = arith.constant 0 : index
    %23 = vector.load %arg8[%c0_10, %c0_11] : memref<16x128xf32, #tpu.memory_space<vmem>>, vector<16x128xf32>
    %c0_12 = arith.constant 0 : index
    %c0_13 = arith.constant 0 : index
    %24 = vector.load %arg5[%c0_12, %c0_13] : memref<128x128xbf16, #tpu.memory_space<vmem>>, vector<128x128xbf16>
    %cst_14 = arith.constant dense<0.000000e+00> : vector<16x128xf32>
    %25 = tpu.matmul %22, %24, %cst_14 {dimension_numbers = #tpu.dot_dimension_numbers<[1], [0], [0], [1], [0, 0, 1, 1], [], []>} : vector<16x128xbf16>, vector<128x128xbf16>, vector<16x128xf32> -> vector<16x128xf32>
    %26 = arith.addf %23, %25 : vector<16x128xf32>
    %c0_15 = arith.constant 0 : index
    %c0_16 = arith.constant 0 : index
    %27 = vector.load %arg8[%c0_15, %c0_16] : memref<16x128xf32, #tpu.memory_space<vmem>>, vector<16x128xf32>
    tpu.vector_store %arg8[%c0_15, %c0_16], %26 {strides = array<i32>} : memref<16x128xf32, #tpu.memory_space<vmem>>, vector<16x128xf32>,
    %c0_i32_17 = arith.constant 0 : i32
    %28 = arith.cmpi eq, %arg1, %c0_i32_17 : i32
    %29 = arith.extui %28 : i1 to i32
    %c0_i32_18 = arith.constant 0 : i32
    %30 = arith.cmpi ne, %29, %c0_i32_18 : i32
    scf.if %30 {
      %c0_19 = arith.constant 0 : index
      %c0_20 = arith.constant 0 : index
      %31 = vector.load %arg8[%c0_19, %c0_20] : memref<16x128xf32, #tpu.memory_space<vmem>>, vector<16x128xf32>
      %c0_21 = arith.constant 0 : index
      %c0_22 = arith.constant 0 : index
      %32 = vector.load %arg6[%c0_21, %c0_22] : memref<1x128xf32, #tpu.memory_space<vmem>>, vector<1x128xf32>
      %33 = vector.broadcast %32 : vector<1x128xf32> to vector<16x128xf32>
      %34 = arith.addf %31, %33 : vector<16x128xf32>
      %c0_23 = arith.constant 0 : index
      %c0_24 = arith.constant 0 : index
      %35 = vector.load %arg7[%c0_23, %c0_24] : memref<16x128xf32, #tpu.memory_space<vmem>>, vector<16x128xf32>
      tpu.vector_store %arg7[%c0_23, %c0_24], %34 {strides = array<i32>} : memref<16x128xf32, #tpu.memory_space<vmem>>, vector<16x128xf32>,
    } else {
    }
    return
  }
  func.func @transform_0(%arg0: i32, %arg1: i32) -> (i32, i32) {
    %c0_i32 = arith.constant 0 : i32
    %c0_i32_0 = arith.constant 0 : i32
    return %arg0, %c0_i32 : i32, i32
  }
  func.func @transform_1(%arg0: i32, %arg1: i32) -> (i32, i32) {
    %c0_i32 = arith.constant 0 : i32
    %c0_i32_0 = arith.constant 0 : i32
    return %c0_i32, %arg1 : i32, i32
  }
  func.func @transform_2(%arg0: i32, %arg1: i32) -> (i32, i32) {
    %c0_i32 = arith.constant 0 : i32
    %c0_i32_0 = arith.constant 0 : i32
    return %c0_i32, %arg1 : i32, i32
  }
  func.func @transform_3(%arg0: i32, %arg1: i32) -> (i32, i32) {
    %c0_i32 = arith.constant 0 : i32
    %c0_i32_0 = arith.constant 0 : i32
    return %arg1, %c0_i32 : i32, i32
  }
  func.func @transform_4(%arg0: i32, %arg1: i32) -> (i32, i32) {
    %c0_i32 = arith.constant 0 : i32
    %c0_i32_0 = arith.constant 0 : i32
    %c0_i32_1 = arith.constant 0 : i32
    return %c0_i32, %c0_i32_0 : i32, i32
  }
  func.func @transform_5(%arg0: i32, %arg1: i32) -> (i32, i32) {
    %c0_i32 = arith.constant 0 : i32
    %c0_i32_0 = arith.constant 0 : i32
    return %arg0, %c0_i32 : i32, i32
  }
}

</mosaic_0001>

<bundles_post_ra>
// kernel: tpu_custom_call.1
= control target key start
LH: loop header
LB: loop body
LE: loop exit
PB: predicated region body
PF: predicated region fallthrough
CT: control target
= control target key end

     0   :  { %10 = vsyncpa [#allocation4], 0  ;;  %s665_s0 = inlined_call_operand.hbm [shape: bf16[16,128], index: 0, kind: input, shape index: {}]   ;;  %s666_s1 = inlined_call_operand.hbm [shape: bf16[128,128], index: 1, kind: input, shape index: {}]   ;;  %s667_s2 = inlined_call_operand.vmem [shape: f32[1,128], index: 2, kind: input, shape index: {}]   ;;  %s668_s3 = inlined_call_operand.hbm [shape: bf16[128,128], index: 3, kind: input, shape index: {}]   ;;  %s669_s4 = inlined_call_operand.vmem [shape: f32[1,128], index: 4, kind: input, shape index: {}]   ;;  %s670_s5 = inlined_call_operand.hbm [shape: f32[16,128], index: 5, kind: output, shape index: {}]  }
   0x1   :  { %11 = vsyncpa [#allocation7], 0 }
   0x2   :  { %12 = vsyncpa [#allocation5], 0  ;;  %s555_s18 = smov [#allocation6]   ;;  %s556_s20 = smov [#allocation3]  }
   0x3   :  { %s30_s19 = sshll.u32 %s555_s18, 4  ;;  %s18_s21 = sshll.u32 %s556_s20, 4  ;;  %s31_s19 = int_to_ptr.vmem [resolvable:$true] %s30_s19  ;;  %s595_s21 = int_to_ptr.vmem [resolvable:$true] %s18_s21 }
   0x4   :  { %s461_s24 = scalar_lea.hbm %s666_s1, 1024 }
   0x5   :  { %p462_p0 = scmp.ne.s32.totalorder %s666_s1, %s461_s24  ;;  %p465_p1 = scmp.lt.u32.totalorder %s461_s24, %s666_s1 }
   0x7   :  { %p467_p2 = pnand %p465_p1, %p462_p0 }
   0x9   :  { %470 = shalt.err (!%p467_p2)
}
   0xa   :  { %s471_s29 = scalar_lea.vmem %s31_s19, 1024  ;;  %p476_p4 = scmp.lt.s32.totalorder %s31_s19, %s31_s19 }
   0xb   :  { %p472_p3 = scmp.ne.s32.totalorder %s31_s19, %s471_s29  ;;  %p477_p5 = scmp.lt.s32.totalorder %s471_s29, %s471_s29 }
   0xd   :  { %p478_p6 = por %p477_p5, %p476_p4 }
   0xf   :  { %p479_p7 = pnand %p478_p6, %p472_p3 }
  0x11   :  { %482 = shalt.err (!%p479_p7)
}
  0x12   :  { %s557_s30 = smov 64   ;;  %s558_s6 = smov 4  }
  0x13   :  { %36 = dma.hbm_to_vmem [thread:$0]  %s666_s1, 1024, %s31_s19, [#allocation7], %s557_s30, %s557_s30, %s558_s6  }
  0x14   :  { %s483_s11 = scalar_lea.hbm %s665_s0, 128 }
  0x15   :  { %p484_p8 = scmp.ne.s32.totalorder %s665_s0, %s483_s11  ;;  %p487_p9 = scmp.lt.u32.totalorder %s483_s11, %s665_s0 }
  0x17   :  { %p489_p10 = pnand %p487_p9, %p484_p8 }
  0x19   :  { %492 = shalt.err (!%p489_p10)
}
  0x1a   :  { %s493_s16 = scalar_lea.vmem %s595_s21, 128  ;;  %p498_p12 = scmp.lt.s32.totalorder %s595_s21, %s595_s21 }
  0x1b   :  { %p494_p11 = scmp.ne.s32.totalorder %s595_s21, %s493_s16  ;;  %p499_p13 = scmp.lt.s32.totalorder %s493_s16, %s493_s16 }
  0x1d   :  { %p500_p0 = por %p499_p13, %p498_p12 }
  0x1f   :  { %p501_p1 = pnand %p500_p0, %p494_p11 }
  0x21   :  { %504 = shalt.err (!%p501_p1)
}
  0x22   :  { %24 = dma.hbm_to_vmem [thread:$0]  %s665_s0, 128, %s595_s21, [#allocation4], %s557_s30, %s557_s30, %s558_s6  }
  0x23   :  { %s559_s18 = smov [#allocation8]   ;;  %s505_s23 = scalar_lea.hbm %s668_s3, 1024 }
  0x24   :  { %s44_s19 = sshll.u32 %s559_s18, 4  ;;  %p506_p2 = scmp.ne.s32.totalorder %s668_s3, %s505_s23  ;;  %s45_s19 = int_to_ptr.vmem [resolvable:$true] %s44_s19 }
  0x25   :  { %p509_p3 = scmp.lt.u32.totalorder %s505_s23, %s668_s3 }
  0x27   :  { %p511_p4 = pnand %p509_p3, %p506_p2 }
  0x29   :  { %514 = shalt.err (!%p511_p4)
}
  0x2a   :  { %s515_s28 = scalar_lea.vmem %s45_s19, 1024  ;;  %p520_p6 = scmp.lt.s32.totalorder %s45_s19, %s45_s19 }
  0x2b   :  { %p516_p5 = scmp.ne.s32.totalorder %s45_s19, %s515_s28  ;;  %p521_p7 = scmp.lt.s32.totalorder %s515_s28, %s515_s28 }
  0x2d   :  { %p522_p8 = por %p521_p7, %p520_p6 }
  0x2f   :  { %p523_p9 = pnand %p522_p8, %p516_p5 }
  0x31   :  { %526 = shalt.err (!%p523_p9)
}
  0x32   :  { %50 = dma.hbm_to_vmem [thread:$0]  %s668_s3, 1024, %s45_s19, [#allocation7], %s557_s30, %s557_s30, %s558_s6  }
  0x33   :  { %549 = dma.done.wait [#allocation4], 128  }
  0x34   :  { %550 = vsyncadd [#allocation4], 4294967168 }
  0x35   :  { %551 = dma.done.wait [#allocation7], 2048  }
  0x36   :  { %552 = vsyncadd [#allocation7], 4294965248  ;;  %v560_v0 = vmov 0.0   ;;  %vm561_vm0 = vmmov 0   ;;  %v440_v1 = vld [vmem:[#allocation6] sm:$0xff]   ;;  %v441_v2 = vld [vmem:[#allocation6 + $0x8] sm:$0xff]  }
  0x37   :  { %390 = vmatprep.subr.bf16.mxu0 %v560_v0  ;;  %406 = vmatprep.mubr.msk.bf16.mxu0 %vm561_vm0, %v560_v0  ;;  %v442_v3 = vld [vmem:[#allocation6 + $0x10] sm:$0xff]   ;;  %v443_v4 = vld [vmem:[#allocation6 + $0x18] sm:$0xff]   ;;  %v444_v5 = vld [vmem:[#allocation6 + $0x20] sm:$0xff]   ;;  %s562_s6 = smov [#allocation9]  }
  0x38   :  { %410 = vmatprep.subr.bf16.mxu1 %v560_v0  ;;  %426 = vmatprep.mubr.msk.bf16.mxu1 %vm561_vm0, %v560_v0  ;;  %v445_v6 = vld [vmem:[#allocation6 + $0x28] sm:$0xff]   ;;  %v446_v7 = vld [vmem:[#allocation6 + $0x30] sm:$0xff]   ;;  %v447_v8 = vld [vmem:[#allocation6 + $0x38] sm:$0xff]   ;;  %s340_s7 = sshll.u32 %s562_s6, 4  ;;  %s341_s7 = int_to_ptr.vmem [resolvable:$true] %s340_s7 }
  0x39   :  { %391 = vmatpush3.bf16.msra.mxu0 %v440_v1  ;;  %v448_v9 = vld [vmem:[#allocation3] sm:$0xff]   ;;  %v449_v10 = vld [vmem:[#allocation8] sm:$0xff]   ;;  %v450_v11 = vld [vmem:[#allocation8 + $0x8] sm:$0xff]   ;;  %s527_s8 = scalar_lea.vmem %s341_s7, 256  ;;  %p532_p11 = scmp.lt.s32.totalorder %s341_s7, %s341_s7 }
  0x3a   :  { %392 = vmatprep.subr.bf16.mxu0 %v560_v0  ;;  %411 = vmatpush3.bf16.msra.mxu1 %v449_v10  ;;  %v451_v12 = vld [vmem:[#allocation8 + $0x10] sm:$0xff]   ;;  %v452_v13 = vld [vmem:[#allocation8 + $0x18] sm:$0xff]   ;;  %v453_v14 = vld [vmem:[#allocation8 + $0x20] sm:$0xff]   ;;  %p528_p10 = scmp.ne.s32.totalorder %s341_s7, %s527_s8  ;;  %p533_p12 = scmp.lt.s32.totalorder %s527_s8, %s527_s8 }
  0x3b   :  { %412 = vmatprep.subr.bf16.mxu1 %v560_v0  ;;  %v454_v15 = vld [vmem:[#allocation8 + $0x28] sm:$0xff]   ;;  %v455_v16 = vld [vmem:[#allocation8 + $0x30] sm:$0xff]   ;;  %v456_v17 = vld [vmem:[#allocation8 + $0x38] sm:$0xff]  }
  0x3c   :  { %v353_v18 = vld [vmem:[%s667_s2] ss:$0 sm:$0xff]  ;;  %p534_p13 = por %p533_p12, %p532_p11 }
  0x3d   :  { %393 = vmatpush3.bf16.msra.mxu0 %v441_v2  ;;  %v371_v44 = vld [vmem:[%s669_s4] ss:$0 sm:$0xff] }
  0x3e   :  { %394 = vmatprep.subr.bf16.mxu0 %v560_v0  ;;  %413 = vmatpush3.bf16.msra.mxu1 %v450_v11  ;;  %p535_p0 = pnand %p534_p13, %p528_p10 }
  0x3f   :  { %414 = vmatprep.subr.bf16.mxu1 %v560_v0 }
  0x41   :  { %395 = vmatpush3.bf16.msra.mxu0 %v442_v3 }
  0x42   :  { %396 = vmatprep.subr.bf16.mxu0 %v560_v0  ;;  %415 = vmatpush3.bf16.msra.mxu1 %v451_v12 }
  0x43   :  { %416 = vmatprep.subr.bf16.mxu1 %v560_v0 }
  0x45   :  { %397 = vmatpush3.bf16.msra.mxu0 %v443_v4 }
  0x46   :  { %398 = vmatprep.subr.bf16.mxu0 %v560_v0  ;;  %417 = vmatpush3.bf16.msra.mxu1 %v452_v13 }
  0x47   :  { %418 = vmatprep.subr.bf16.mxu1 %v560_v0 }
  0x49   :  { %399 = vmatpush3.bf16.msra.mxu0 %v444_v5 }
  0x4a   :  { %400 = vmatprep.subr.bf16.mxu0 %v560_v0  ;;  %419 = vmatpush3.bf16.msra.mxu1 %v453_v14 }
  0x4b   :  { %420 = vmatprep.subr.bf16.mxu1 %v560_v0 }
  0x4d   :  { %401 = vmatpush3.bf16.msra.mxu0 %v445_v6 }
  0x4e   :  { %402 = vmatprep.subr.bf16.mxu0 %v560_v0  ;;  %421 = vmatpush3.bf16.msra.mxu1 %v454_v15 }
  0x4f   :  { %422 = vmatprep.subr.bf16.mxu1 %v560_v0 }
  0x51   :  { %403 = vmatpush3.bf16.msra.mxu0 %v446_v7 }
  0x52   :  { %404 = vmatprep.subr.bf16.mxu0 %v560_v0  ;;  %423 = vmatpush3.bf16.msra.mxu1 %v455_v16 }
  0x53   :  { %424 = vmatprep.subr.bf16.mxu1 %v560_v0 }
  0x55   :  { %405 = vmatpush3.bf16.msra.mxu0 %v447_v8 }
  0x56   :  { %425 = vmatpush3.bf16.msra.mxu1 %v456_v17 }
  0x58   :  { %407 = vmatmul.mubr.bf16.vlgmr.msra.gmra.mrb[0].mxu0 %v448_v9 }
 0x12b   :  { %v182_v19 = vpop.f32.mrb[0].mxu0 }
 0x12c   :  { %v183_v20 = vadd.f32 %v353_v18, %v182_v19  ;;  %v408_v21 = vpop.f32.mrb[1].mxu0 }
 0x12d   :  { %v185_v22 = vpop.f32.mrb[2].mxu0 }
 0x12e   :  { %v191_v23 = vmul.f32 0.044715, %v183_v20  ;;  %v186_v24 = vadd.f32 %v353_v18, %v185_v22  ;;  %v409_v25 = vpop.f32.mrb[3].mxu0  ;;  %v189_v38 = vmul.f32 0.5, %v183_v20 }
 0x130   :  { %v193_v26 = vmul.f32 %v191_v23, %v183_v20  ;;  %v192_v27 = vmul.f32 0.044715, %v186_v24  ;;  %v190_v39 = vmul.f32 0.5, %v186_v24 }
 0x132   :  { %v195_v28 = vmul.f32 %v193_v26, %v183_v20  ;;  %v194_v29 = vmul.f32 %v192_v27, %v186_v24 }
 0x134   :  { %v196_v30 = vmul.f32 %v194_v29, %v186_v24  ;;  %v197_v31 = vadd.f32 %v195_v28, %v183_v20 }
 0x136   :  { %v198_v32 = vadd.f32 %v196_v30, %v186_v24  ;;  %v199_v33 = vmul.f32 0.7978846, %v197_v31 }
 0x138   :  { %v200_v34 = vmul.f32 0.7978846, %v198_v32  ;;  %457 = vtanh.f32 %v199_v33 }
 0x13a   :  { %459 = vtanh.f32 %v200_v34 }
 0x142   :  { %v458_v35 = vpop.eup %457 }
 0x143   :  { %v203_v36 = vadd.f32 1.0, %v458_v35 }
 0x144   :  { %v460_v37 = vpop.eup %459 }
 0x145   :  { %v204_v40 = vadd.f32 1.0, %v460_v37  ;;  %v205_v41 = vmul.f32 %v203_v36, %v189_v38 }
 0x147   :  { %v206_v42 = vmul.f32 %v204_v40, %v190_v39 }
 0x149   :  { %v207_v43 = vpack.c.bf16 %v206_v42, %v205_v41 }
 0x14b   :  { %427 = vmatmul.mubr.bf16.vlgmr.msra.gmra.mrb[0].mxu1 %v207_v43 }
 0x21e   :  { %v308_v45 = vpop.f32.mrb[0].mxu1 }
 0x21f   :  { %v331_v46 = vadd.f32 %v371_v44, %v308_v45  ;;  %v428_v47 = vpop.f32.mrb[1].mxu1 }
 0x220   :  { %v311_v48 = vpop.f32.mrb[2].mxu1 }
 0x221   :  { %333 = vst [vmem:[#allocation9] sm:$0xff] %v331_v46  ;;  %v332_v49 = vadd.f32 %v371_v44, %v311_v48  ;;  %v429_v50 = vpop.f32.mrb[3].mxu1 }
 0x223   :  { %334 = vst [vmem:[#allocation9 + $0x8] sm:$0xff] %v332_v49 }
 0x224   :  { %538 = shalt.err (!%p535_p0)
}
 0x225   :  { %s539_s10 = scalar_lea.hbm %s670_s5, 256 }
 0x226   :  { %p540_p1 = scmp.ne.s32.totalorder %s670_s5, %s539_s10  ;;  %p543_p2 = scmp.lt.u32.totalorder %s539_s10, %s670_s5 }
 0x228   :  { %p545_p3 = pnand %p543_p2, %p540_p1 }
 0x22a   :  { %548 = shalt.err (!%p545_p3)
}
 0x22b   :  { %s563_s15 = smov 128   ;;  %s564_s16 = smov 8  }
 0x22c   :  { %346 = dma.vmem_to_hbm [thread:$0]  %s341_s7, 256, %s670_s5, [#allocation5], %s563_s15, %s563_s15, %s564_s16  }
 0x22d   :  { %553 = dma.done.wait [#allocation5], 256  }
 0x22e   :  { %554 = vsyncadd [#allocation5], 4294967040 }
 0x22f   :  { %350 = vsyncpa [#allocation4], 1 }
 0x230   :  { %351 = vsyncpa [#allocation7], 1 }
 0x231   :  { %352 = vsyncpa [#allocation5], 1 }

// kernel: tpu_custom_call.1
= control target key start
LH: loop header
LB: loop body
LE: loop exit
PB: predicated region body
PF: predicated region fallthrough
CT: control target
= control target key end

     0   :  { %10 = vsyncpa [#allocation4], 0  ;;  %s665_s0 = inlined_call_operand.hbm [shape: bf16[16,128], index: 0, kind: input, shape index: {}]   ;;  %s666_s1 = inlined_call_operand.hbm [shape: bf16[128,128], index: 1, kind: input, shape index: {}]   ;;  %s667_s2 = inlined_call_operand.vmem [shape: f32[1,128], index: 2, kind: input, shape index: {}]   ;;  %s668_s3 = inlined_call_operand.hbm [shape: bf16[128,128], index: 3, kind: input, shape index: {}]   ;;  %s669_s4 = inlined_call_operand.vmem [shape: f32[1,128], index: 4, kind: input, shape index: {}]   ;;  %s670_s5 = inlined_call_operand.hbm [shape: f32[16,128], index: 5, kind: output, shape index: {}]  }
   0x1   :  { %11 = vsyncpa [#allocation7], 0 }
   0x2   :  { %12 = vsyncpa [#allocation5], 0  ;;  %s555_s18 = smov [#allocation6]   ;;  %s556_s20 = smov [#allocation3]  }
   0x3   :  { %s30_s19 = sshll.u32 %s555_s18, 4  ;;  %s18_s21 = sshll.u32 %s556_s20, 4  ;;  %s31_s19 = int_to_ptr.vmem [resolvable:$true] %s30_s19  ;;  %s595_s21 = int_to_ptr.vmem [resolvable:$true] %s18_s21 }
   0x4   :  { %s461_s24 = scalar_lea.hbm %s666_s1, 1024 }
   0x5   :  { %p462_p0 = scmp.ne.s32.totalorder %s666_s1, %s461_s24  ;;  %p465_p1 = scmp.lt.u32.totalorder %s461_s24, %s666_s1 }
   0x7   :  { %p467_p2 = pnand %p465_p1, %p462_p0 }
   0x9   :  { %470 = shalt.err (!%p467_p2)
}
   0xa   :  { %s471_s29 = scalar_lea.vmem %s31_s19, 1024  ;;  %p476_p4 = scmp.lt.s32.totalorder %s31_s19, %s31_s19 }
   0xb   :  { %p472_p3 = scmp.ne.s32.totalorder %s31_s19, %s471_s29  ;;  %p477_p5 = scmp.lt.s32.totalorder %s471_s29, %s471_s29 }
   0xd   :  { %p478_p6 = por %p477_p5, %p476_p4 }
   0xf   :  { %p479_p7 = pnand %p478_p6, %p472_p3 }
  0x11   :  { %482 = shalt.err (!%p479_p7)
}
  0x12   :  { %s557_s30 = smov 64   ;;  %s558_s6 = smov 4  }
  0x13   :  { %36 = dma.hbm_to_vmem [thread:$0]  %s666_s1, 1024, %s31_s19, [#allocation7], %s557_s30, %s557_s30, %s558_s6  }
  0x14   :  { %s483_s11 = scalar_lea.hbm %s665_s0, 128 }
  0x15   :  { %p484_p8 = scmp.ne.s32.totalorder %s665_s0, %s483_s11  ;;  %p487_p9 = scmp.lt.u32.totalorder %s483_s11, %s665_s0 }
  0x17   :  { %p489_p10 = pnand %p487_p9, %p484_p8 }
  0x19   :  { %492 = shalt.err (!%p489_p10)
}
  0x1a   :  { %s493_s16 = scalar_lea.vmem %s595_s21, 128  ;;  %p498_p12 = scmp.lt.s32.totalorder %s595_s21, %s595_s21 }
  0x1b   :  { %p494_p11 = scmp.ne.s32.totalorder %s595_s21, %s493_s16  ;;  %p499_p13 = scmp.lt.s32.totalorder %s493_s16, %s493_s16 }
  0x1d   :  { %p500_p0 = por %p499_p13, %p498_p12 }
  0x1f   :  { %p501_p1 = pnand %p500_p0, %p494_p11 }
  0x21   :  { %504 = shalt.err (!%p501_p1)
}
  0x22   :  { %24 = dma.hbm_to_vmem [thread:$0]  %s665_s0, 128, %s595_s21, [#allocation4], %s557_s30, %s557_s30, %s558_s6  }
  0x23   :  { %s559_s18 = smov [#allocation8]   ;;  %s505_s23 = scalar_lea.hbm %s668_s3, 1024 }
  0x24   :  { %s44_s19 = sshll.u32 %s559_s18, 4  ;;  %p506_p2 = scmp.ne.s32.totalorder %s668_s3, %s505_s23  ;;  %s45_s19 = int_to_ptr.vmem [resolvable:$true] %s44_s19 }
  0x25   :  { %p509_p3 = scmp.lt.u32.totalorder %s505_s23, %s668_s3 }
  0x27   :  { %p511_p4 = pnand %p509_p3, %p506_p2 }
  0x29   :  { %514 = shalt.err (!%p511_p4)
}
  0x2a   :  { %s515_s28 = scalar_lea.vmem %s45_s19, 1024  ;;  %p520_p6 = scmp.lt.s32.totalorder %s45_s19, %s45_s19 }
  0x2b   :  { %p516_p5 = scmp.ne.s32.totalorder %s45_s19, %s515_s28  ;;  %p521_p7 = scmp.lt.s32.totalorder %s515_s28, %s515_s28 }
  0x2d   :  { %p522_p8 = por %p521_p7, %p520_p6 }
  0x2f   :  { %p523_p9 = pnand %p522_p8, %p516_p5 }
  0x31   :  { %526 = shalt.err (!%p523_p9)
}
  0x32   :  { %50 = dma.hbm_to_vmem [thread:$0]  %s668_s3, 1024, %s45_s19, [#allocation7], %s557_s30, %s557_s30, %s558_s6  }
  0x33   :  { %549 = dma.done.wait [#allocation4], 128  }
  0x34   :  { %550 = vsyncadd [#allocation4], 4294967168 }
  0x35   :  { %551 = dma.done.wait [#allocation7], 2048  }
  0x36   :  { %552 = vsyncadd [#allocation7], 4294965248  ;;  %v560_v0 = vmov 0.0   ;;  %vm561_vm0 = vmmov 0   ;;  %v440_v1 = vld [vmem:[#allocation6] sm:$0xff]   ;;  %v441_v2 = vld [vmem:[#allocation6 + $0x8] sm:$0xff]  }
  0x37   :  { %390 = vmatprep.subr.bf16.mxu0 %v560_v0  ;;  %406 = vmatprep.mubr.msk.bf16.mxu0 %vm561_vm0, %v560_v0  ;;  %v442_v3 = vld [vmem:[#allocation6 + $0x10] sm:$0xff]   ;;  %v443_v4 = vld [vmem:[#allocation6 + $0x18] sm:$0xff]   ;;  %v444_v5 = vld [vmem:[#allocation6 + $0x20] sm:$0xff]   ;;  %s562_s6 = smov [#allocation9]  }
  0x38   :  { %410 = vmatprep.subr.bf16.mxu1 %v560_v0  ;;  %426 = vmatprep.mubr.msk.bf16.mxu1 %vm561_vm0, %v560_v0  ;;  %v445_v6 = vld [vmem:[#allocation6 + $0x28] sm:$0xff]   ;;  %v446_v7 = vld [vmem:[#allocation6 + $0x30] sm:$0xff]   ;;  %v447_v8 = vld [vmem:[#allocation6 + $0x38] sm:$0xff]   ;;  %s340_s7 = sshll.u32 %s562_s6, 4  ;;  %s341_s7 = int_to_ptr.vmem [resolvable:$true] %s340_s7 }
  0x39   :  { %391 = vmatpush3.bf16.msra.mxu0 %v440_v1  ;;  %v448_v9 = vld [vmem:[#allocation3] sm:$0xff]   ;;  %v449_v10 = vld [vmem:[#allocation8] sm:$0xff]   ;;  %v450_v11 = vld [vmem:[#allocation8 + $0x8] sm:$0xff]   ;;  %s527_s8 = scalar_lea.vmem %s341_s7, 256  ;;  %p532_p11 = scmp.lt.s32.totalorder %s341_s7, %s341_s7 }
  0x3a   :  { %392 = vmatprep.subr.bf16.mxu0 %v560_v0  ;;  %411 = vmatpush3.bf16.msra.mxu1 %v449_v10  ;;  %v451_v12 = vld [vmem:[#allocation8 + $0x10] sm:$0xff]   ;;  %v452_v13 = vld [vmem:[#allocation8 + $0x18] sm:$0xff]   ;;  %v453_v14 = vld [vmem:[#allocation8 + $0x20] sm:$0xff]   ;;  %p528_p10 = scmp.ne.s32.totalorder %s341_s7, %s527_s8  ;;  %p533_p12 = scmp.lt.s32.totalorder %s527_s8, %s527_s8 }
  0x3b   :  { %412 = vmatprep.subr.bf16.mxu1 %v560_v0  ;;  %v454_v15 = vld [vmem:[#allocation8 + $0x28] sm:$0xff]   ;;  %v455_v16 = vld [vmem:[#allocation8 + $0x30] sm:$0xff]   ;;  %v456_v17 = vld [vmem:[#allocation8 + $0x38] sm:$0xff]  }
  0x3c   :  { %v353_v18 = vld [vmem:[%s667_s2] ss:$0 sm:$0xff]  ;;  %p534_p13 = por %p533_p12, %p532_p11 }
  0x3d   :  { %393 = vmatpush3.bf16.msra.mxu0 %v441_v2  ;;  %v371_v44 = vld [vmem:[%s669_s4] ss:$0 sm:$0xff] }
  0x3e   :  { %394 = vmatprep.subr.bf16.mxu0 %v560_v0  ;;  %413 = vmatpush3.bf16.msra.mxu1 %v450_v11  ;;  %p535_p0 = pnand %p534_p13, %p528_p10 }
  0x3f   :  { %414 = vmatprep.subr.bf16.mxu1 %v560_v0 }
  0x41   :  { %395 = vmatpush3.bf16.msra.mxu0 %v442_v3 }
  0x42   :  { %396 = vmatprep.subr.bf16.mxu0 %v560_v0  ;;  %415 = vmatpush3.bf16.msra.mxu1 %v451_v12 }
  0x43   :  { %416 = vmatprep.subr.bf16.mxu1 %v560_v0 }
  0x45   :  { %397 = vmatpush3.bf16.msra.mxu0 %v443_v4 }
  0x46   :  { %398 = vmatprep.subr.bf16.mxu0 %v560_v0  ;;  %417 = vmatpush3.bf16.msra.mxu1 %v452_v13 }
  0x47   :  { %418 = vmatprep.subr.bf16.mxu1 %v560_v0 }
  0x49   :  { %399 = vmatpush3.bf16.msra.mxu0 %v444_v5 }
  0x4a   :  { %400 = vmatprep.subr.bf16.mxu0 %v560_v0  ;;  %419 = vmatpush3.bf16.msra.mxu1 %v453_v14 }
  0x4b   :  { %420 = vmatprep.subr.bf16.mxu1 %v560_v0 }
  0x4d   :  { %401 = vmatpush3.bf16.msra.mxu0 %v445_v6 }
  0x4e   :  { %402 = vmatprep.subr.bf16.mxu0 %v560_v0  ;;  %421 = vmatpush3.bf16.msra.mxu1 %v454_v15 }
  0x4f   :  { %422 = vmatprep.subr.bf16.mxu1 %v560_v0 }
  0x51   :  { %403 = vmatpush3.bf16.msra.mxu0 %v446_v7 }
  0x52   :  { %404 = vmatprep.subr.bf16.mxu0 %v560_v0  ;;  %423 = vmatpush3.bf16.msra.mxu1 %v455_v16 }
  0x53   :  { %424 = vmatprep.subr.bf16.mxu1 %v560_v0 }
  0x55   :  { %405 = vmatpush3.bf16.msra.mxu0 %v447_v8 }
  0x56   :  { %425 = vmatpush3.bf16.msra.mxu1 %v456_v17 }
  0x58   :  { %407 = vmatmul.mubr.bf16.vlgmr.msra.gmra.mrb[0].mxu0 %v448_v9 }
 0x12b   :  { %v182_v19 = vpop.f32.mrb[0].mxu0 }
 0x12c   :  { %v183_v20 = vadd.f32 %v353_v18, %v182_v19  ;;  %v408_v21 = vpop.f32.mrb[1].mxu0 }
 0x12d   :  { %v185_v22 = vpop.f32.mrb[2].mxu0 }
 0x12e   :  { %v191_v23 = vmul.f32 0.044715, %v183_v20  ;;  %v186_v24 = vadd.f32 %v353_v18, %v185_v22  ;;  %v409_v25 = vpop.f32.mrb[3].mxu0  ;;  %v189_v38 = vmul.f32 0.5, %v183_v20 }
 0x130   :  { %v193_v26 = vmul.f32 %v191_v23, %v183_v20  ;;  %v192_v27 = vmul.f32 0.044715, %v186_v24  ;;  %v190_v39 = vmul.f32 0.5, %v186_v24 }
 0x132   :  { %v195_v28 = vmul.f32 %v193_v26, %v183_v20  ;;  %v194_v29 = vmul.f32 %v192_v27, %v186_v24 }
 0x134   :  { %v196_v30 = vmul.f32 %v194_v29, %v186_v24  ;;  %v197_v31 = vadd.f32 %v195_v28, %v183_v20 }
 0x136   :  { %v198_v32 = vadd.f32 %v196_v30, %v186_v24  ;;  %v199_v33 = vmul.f32 0.7978846, %v197_v31 }
 0x138   :  { %v200_v34 = vmul.f32 0.7978846, %v198_v32  ;;  %457 = vtanh.f32 %v199_v33 }
 0x13a   :  { %459 = vtanh.f32 %v200_v34 }
 0x142   :  { %v458_v35 = vpop.eup %457 }
 0x143   :  { %v203_v36 = vadd.f32 1.0, %v458_v35 }
 0x144   :  { %v460_v37 = vpop.eup %459 }
 0x145   :  { %v204_v40 = vadd.f32 1.0, %v460_v37  ;;  %v205_v41 = vmul.f32 %v203_v36, %v189_v38 }
 0x147   :  { %v206_v42 = vmul.f32 %v204_v40, %v190_v39 }
 0x149   :  { %v207_v43 = vpack.c.bf16 %v206_v42, %v205_v41 }
 0x14b   :  { %427 = vmatmul.mubr.bf16.vlgmr.msra.gmra.mrb[0].mxu1 %v207_v43 }
 0x21e   :  { %v308_v45 = vpop.f32.mrb[0].mxu1 }
 0x21f   :  { %v331_v46 = vadd.f32 %v371_v44, %v308_v45  ;;  %v428_v47 = vpop.f32.mrb[1].mxu1 }
 0x220   :  { %v311_v48 = vpop.f32.mrb[2].mxu1 }
 0x221   :  { %333 = vst [vmem:[#allocation9] sm:$0xff] %v331_v46  ;;  %v332_v49 = vadd.f32 %v371_v44, %v311_v48  ;;  %v429_v50 = vpop.f32.mrb[3].mxu1 }
 0x223   :  { %334 = vst [vmem:[#allocation9 + $0x8] sm:$0xff] %v332_v49 }
 0x224   :  { %538 = shalt.err (!%p535_p0)
}
 0x225   :  { %s539_s10 = scalar_lea.hbm %s670_s5, 256 }
 0x226   :  { %p540_p1 = scmp.ne.s32.totalorder %s670_s5, %s539_s10  ;;  %p543_p2 = scmp.lt.u32.totalorder %s539_s10, %s670_s5 }
 0x228   :  { %p545_p3 = pnand %p543_p2, %p540_p1 }
 0x22a   :  { %548 = shalt.err (!%p545_p3)
}
 0x22b   :  { %s563_s15 = smov 128   ;;  %s564_s16 = smov 8  }
 0x22c   :  { %346 = dma.vmem_to_hbm [thread:$0]  %s341_s7, 256, %s670_s5, [#allocation5], %s563_s15, %s563_s15, %s564_s16  }
 0x22d   :  { %553 = dma.done.wait [#allocation5], 256  }
 0x22e   :  { %554 = vsyncadd [#allocation5], 4294967040 }
 0x22f   :  { %350 = vsyncpa [#allocation4], 1 }
 0x230   :  { %351 = vsyncpa [#allocation7], 1 }
 0x231   :  { %352 = vsyncpa [#allocation5], 1 }

</bundles_post_ra>
